<compile_context>
chip_gen: v7x
topology: tpu7x:2x2x1
jax: 0.10.0
libtpu: 0.0.40
codegen_flags: <defaults>
</compile_context>

<pallas_src>
import functools

import jax
import jax.numpy as jnp
from jax.experimental import pallas as pl
from jax.experimental.pallas import tpu as pltpu


def _round_up(x, m):
    return (x + m - 1) // m * m


def _vmem_limit_bytes():
    cap = 64 * 1024 * 1024
    try:
        cap = int(getattr(pltpu.get_tpu_info(), "vmem_capacity_bytes", cap))
    except Exception:
        pass
    # Leave headroom for Mosaic internal scratch; cap the ask on big-VMEM generations.
    # v7x (64 MiB)  -> 48 MiB;  v5e/v6e (128 MiB) -> 112 MiB;  unknown -> 48 MiB.
    return max(32 * 1024 * 1024, min(cap - 16 * 1024 * 1024, 112 * 1024 * 1024))


_VMEM_LIMIT = _vmem_limit_bytes()


# ---------------------------- Tiled GEMM (+ optional bias) on the MXU ----------------------------

def _make_matmul_kernel(has_bias, multi_k):
    if multi_k:
        def kernel(*refs):
            if has_bias:
                a_ref, b_ref, bias_ref, o_ref, acc_ref = refs
            else:
                a_ref, b_ref, o_ref, acc_ref = refs

            @pl.when(pl.program_id(2) == 0)
            def _():
                acc_ref[...] = jnp.zeros_like(acc_ref)

            acc_ref[...] += jnp.dot(a_ref[...], b_ref[...],
                                    preferred_element_type=jnp.float32)

            @pl.when(pl.program_id(2) == pl.num_programs(2) - 1)
            def _():
                r = acc_ref[...]
                if has_bias:
                    r = r + bias_ref[...]
                o_ref[...] = r.astype(o_ref.dtype)
    else:
        # Single-K-tile fast path: no accumulator, no predication, direct lane-dense store.
        def kernel(*refs):
            if has_bias:
                a_ref, b_ref, bias_ref, o_ref = refs
            else:
                a_ref, b_ref, o_ref = refs
            r = jnp.dot(a_ref[...], b_ref[...], preferred_element_type=jnp.float32)
            if has_bias:
                r = r + bias_ref[...]
            o_ref[...] = r.astype(o_ref.dtype)
    return kernel


def pallas_matmul(a, b, bias=None, *, out_dtype=jnp.float32,
                  tm=512, tn=512, tk=512, single_k_max=1024):
    """C = A @ B (+ bias) with bf16 MXU operands and f32 accumulation.

    Returns the tile-padded (Mp, Np) result in out_dtype; the caller slices off padding.
    When K <= single_k_max the K grid axis is collapsed and K is left unpadded (the partial-K
    tile is consumed directly by the MXU)."""
    M, K = a.shape
    K2, N = b.shape
    assert K == K2
    has_bias = bias is not None

    tm = min(tm, _round_up(M, 16))        # bf16 sublane granularity is 16
    tn = min(tn, _round_up(N, 128))       # full (padded) Cout in one lane-dense tile
    Mp, Np = _round_up(M, tm), _round_up(N, tn)

    a = a.astype(jnp.bfloat16)
    b = b.astype(jnp.bfloat16)

    multi_k = K > single_k_max
    if multi_k:
        tk = min(tk, _round_up(K, 128))
        Kp = _round_up(K, tk)
    else:
        tk = K
        Kp = K

    if (Mp, Kp) != (M, K):
        a = jnp.pad(a, ((0, Mp - M), (0, Kp - K)))
    if (Kp, Np) != (K, N):
        b = jnp.pad(b, ((0, Kp - K), (0, Np - N)))

    args = [a, b]
    if has_bias:
        args.append(jnp.pad(bias.astype(jnp.float32), (0, Np - N)).reshape(1, Np))

    if multi_k:
        grid = (Mp // tm, Np // tn, Kp // tk)
        in_specs = [pl.BlockSpec((tm, tk), lambda i, j, k: (i, k)),
                    pl.BlockSpec((tk, tn), lambda i, j, k: (k, j))]
        if has_bias:
            in_specs.append(pl.BlockSpec((1, tn), lambda i, j, k: (0, j)))
        out_spec = pl.BlockSpec((tm, tn), lambda i, j, k: (i, j))
        scratch = [pltpu.VMEM((tm, tn), jnp.float32)]
        dims = ("parallel", "parallel", "arbitrary")
    else:
        grid = (Mp // tm, Np // tn)
        in_specs = [pl.BlockSpec((tm, tk), lambda i, j: (i, 0)),
                    pl.BlockSpec((tk, tn), lambda i, j: (0, j))]
        if has_bias:
            in_specs.append(pl.BlockSpec((1, tn), lambda i, j: (0, j)))
        out_spec = pl.BlockSpec((tm, tn), lambda i, j: (i, j))
        scratch = []
        dims = ("parallel", "parallel")

    return pl.pallas_call(
        _make_matmul_kernel(has_bias, multi_k),
        out_shape=jax.ShapeDtypeStruct((Mp, Np), out_dtype),
        grid_spec=pltpu.PrefetchScalarGridSpec(
            num_scalar_prefetch=0, grid=grid,
            in_specs=in_specs, out_specs=out_spec, scratch_shapes=scratch),
        compiler_params=pltpu.CompilerParams(
            dimension_semantics=dims, vmem_limit_bytes=_VMEM_LIMIT),
    )(*args)


# ---------------------------- Instance / batch norm (channels-last, R-tiled, 2 passes) ----------------------------

def _norm_stats_kernel(eps, inv_count, x_ref, mean_ref, rstd_ref):
    r = pl.program_id(2)

    @pl.when(r == 0)
    def _():
        mean_ref[...] = jnp.zeros_like(mean_ref)
        rstd_ref[...] = jnp.zeros_like(rstd_ref)

    x = x_ref[...].astype(jnp.float32)                       # (1, tr, tc), f32 stats from bf16 input
    mean_ref[...] += jnp.sum(x, axis=1, keepdims=True)       # running sum
    rstd_ref[...] += jnp.sum(x * x, axis=1, keepdims=True)   # running sum of squares

    @pl.when(r == pl.num_programs(2) - 1)
    def _():
        m = mean_ref[...] * inv_count
        var = jnp.maximum(rstd_ref[...] * inv_count - m * m, 0.0)   # biased variance
        mean_ref[...] = m
        rstd_ref[...] = jax.lax.rsqrt(var + eps)             # EUP rsqrt


def _norm_apply_kernel(x_ref, mean_ref, rstd_ref, scale_ref, shift_ref, o_ref):
    x = x_ref[...].astype(jnp.float32)
    o_ref[...] = ((x - mean_ref[...]) * (rstd_ref[...] * scale_ref[...])
                  + shift_ref[...]).astype(o_ref.dtype)


def pallas_norm_channels_last(y, scale, shift, *, eps=1e-5, per_instance=True, tr=2048):
    """Instance norm (per (n, c) over H*W) or train-mode batch norm (per c over N*H*W),
    both with affine transform.  y is (N, H*W, C), channels on the lane axis (typically bf16).
    Pass 1 reduces sum / sum-of-squares over R tiles; pass 2 applies (x-mean)*rstd*scale+shift."""
    N, HW, C = y.shape
    if per_instance:
        G, R = N, HW
        yg = y
    else:
        G, R = 1, N * HW
        yg = y.reshape(1, N * HW, C)

    tc = 128 if C % 128 == 0 else C
    nC = C // tc

    # Tile the row axis so a single block never exceeds VMEM for large images.
    tr = min(tr, _round_up(R, 8))
    Rp = _round_up(R, tr)
    if Rp != R:
        # Zero padding rows do not perturb the sums; the stats divide by the true R.
        yg = jnp.pad(yg, ((0, 0), (0, Rp - R), (0, 0)))
    nR = Rp // tr

    scale3 = scale.astype(jnp.float32).reshape(1, 1, C)
    shift3 = shift.astype(jnp.float32).reshape(1, 1, C)

    # ---- pass 1: per-(group, channel) mean / rstd (R axis is the reduction, kept innermost) ----
    mean, rstd = pl.pallas_call(
        functools.partial(_norm_stats_kernel, float(eps), 1.0 / float(R)),
        out_shape=(jax.ShapeDtypeStruct((G, 1, C), jnp.float32),
                   jax.ShapeDtypeStruct((G, 1, C), jnp.float32)),
        grid=(G, nC, nR),
        in_specs=[pl.BlockSpec((1, tr, tc), lambda g, c, r: (g, r, c))],
        out_specs=(pl.BlockSpec((1, 1, tc), lambda g, c, r: (g, 0, c)),
                   pl.BlockSpec((1, 1, tc), lambda g, c, r: (g, 0, c))),
        compiler_params=pltpu.CompilerParams(
            dimension_semantics=("parallel", "parallel", "arbitrary"),
            vmem_limit_bytes=_VMEM_LIMIT),
    )(yg)

    # ---- pass 2: normalize + affine (elementwise, fully parallel grid) ----
    out = pl.pallas_call(
        _norm_apply_kernel,
        out_shape=jax.ShapeDtypeStruct((G, Rp, C), jnp.float32),
        grid=(G, nR, nC),
        in_specs=[pl.BlockSpec((1, tr, tc), lambda g, r, c: (g, r, c)),
                  pl.BlockSpec((1, 1, tc), lambda g, r, c: (g, 0, c)),
                  pl.BlockSpec((1, 1, tc), lambda g, r, c: (g, 0, c)),
                  pl.BlockSpec((1, 1, tc), lambda g, r, c: (0, 0, c)),
                  pl.BlockSpec((1, 1, tc), lambda g, r, c: (0, 0, c))],
        out_specs=pl.BlockSpec((1, tr, tc), lambda g, r, c: (g, r, c)),
        compiler_params=pltpu.CompilerParams(
            dimension_semantics=("parallel", "parallel", "parallel"),
            vmem_limit_bytes=_VMEM_LIMIT),
    )(yg, mean, rstd, scale3, shift3)

    if Rp != R:
        out = out[:, :R, :]
    return out.reshape(N, HW, C)


# ---------------------------- ConvLayer forward ----------------------------

def conv_layer_forward(params, x, *, stride, norm_type="instance", eps=1e-5, out_format="NCHW"):
    """PyTorch ConvLayer.forward: reflect-padded Conv2d (padding=k//2) -> instance/batch norm.

    x is NCHW (PyTorch interface).  out_format="NHWC" skips the trailing layout transpose for
    stacked ConvLayers that can consume channels-last directly."""
    w, b = params["conv_w"], params["conv_b"]
    Cout, Cin, kh, kw = w.shape
    pad = kh // 2
    N, C, H, W = x.shape
    assert C == Cin
    if pad > 0:
        assert pad < H and pad < W, "reflect padding requires pad < spatial size"

    # Channels-last + bf16 *before* im2col so the kh*kw patch blow-up is written once in bf16.
    xh = jnp.transpose(x, (0, 2, 3, 1)).astype(jnp.bfloat16)          # (N, H, W, Cin)
    if pad > 0:
        xh = jnp.pad(xh, ((0, 0), (pad, pad), (pad, pad), (0, 0)), mode="reflect")

    # im2col patches (XLA glue): (N, Ho, Wo, Cin*kh*kw); feature order is channel-major
    # (cin, kh, kw), matching w.reshape(Cout, Cin*kh*kw).
    patches = jax.lax.conv_general_dilated_patches(
        xh, filter_shape=(kh, kw), window_strides=(stride, stride),
        padding="VALID", dimension_numbers=("NHWC", "HWIO", "NHWC"))
    _, Ho, Wo, Kdim = patches.shape
    M = N * Ho * Wo

    A = patches.reshape(M, Kdim)
    Bm = w.reshape(Cout, Cin * kh * kw).T                              # (K, Cout)

    has_norm = norm_type != "None"
    # The conv bias is cancelled exactly by the norm's mean subtraction -> fold it out of the
    # GEMM when a norm follows; the GEMM->norm intermediate is written in bf16 in that case.
    gemm_bias = None if has_norm else b
    gemm_dtype = jnp.bfloat16 if has_norm else jnp.float32
    y_p = pallas_matmul(A, Bm, gemm_bias, out_dtype=gemm_dtype)        # (Mp, Np), lane-dense channels
    Mp, Np = y_p.shape
    y = y_p[:M] if Mp != M else y_p
    y = y.reshape(N, Ho * Wo, Np)                                      # keep channel padding through the norm

    if has_norm:
        # TODO(synk): eval-mode BatchNorm (running_mean / running_var) is not implemented;
        # this matches nn.BatchNorm2d / nn.InstanceNorm2d training-mode statistics only.
        sc = jnp.pad(params["norm_w"].astype(jnp.float32), (0, Np - Cout))
        sh = jnp.pad(params["norm_b"].astype(jnp.float32), (0, Np - Cout))
        y = pallas_norm_channels_last(y, sc, sh, eps=eps,
                                      per_instance=(norm_type == "instance"))
    else:
        y = y.astype(jnp.float32)

    y = y[:, :, :Cout].reshape(N, Ho, Wo, Cout)                        # drop lane padding
    if out_format == "NHWC":
        return y                                                       # skip the layout transpose
    return jnp.transpose(y, (0, 3, 1, 2))                              # NCHW (PyTorch interface)


# ---------------------------- Parameters & pure-JAX reference ----------------------------

def init_conv_layer_params(key, in_channels, out_channels, kernel_size, norm_type="instance"):
    k1, k2, k3, k4 = jax.random.split(key, 4)
    fan_in = in_channels * kernel_size * kernel_size
    bound = fan_in ** -0.5
    p = {
        "conv_w": jax.random.uniform(
            k1, (out_channels, in_channels, kernel_size, kernel_size),
            jnp.float32, -bound, bound),
        "conv_b": jax.random.uniform(k2, (out_channels,), jnp.float32, -bound, bound),
    }
    if norm_type != "None":
        # nn.InstanceNorm2d(affine=True) initializes weight=1, bias=0; perturb slightly so the
        # affine path is exercised numerically.
        p["norm_w"] = 1.0 + 0.1 * jax.random.normal(k3, (out_channels,), jnp.float32)
        p["norm_b"] = 0.05 * jax.random.normal(k4, (out_channels,), jnp.float32)
    return p


def _reference_forward(params, x, *, stride, norm_type, eps=1e-5):
    """f32 XLA reference of the PyTorch module (for a loose bf16-tolerance check)."""
    w, b = params["conv_w"], params["conv_b"]
    k = w.shape[-1]
    pad = k // 2
    xp = jnp.pad(x, ((0, 0), (0, 0), (pad, pad), (pad, pad)), mode="reflect") if pad else x
    y = jax.lax.conv_general_dilated(
        xp, w, (stride, stride), "VALID",
        dimension_numbers=("NCHW", "OIHW", "NCHW")) + b.reshape(1, -1, 1, 1)
    if norm_type == "instance":
        axes = (2, 3)
    elif norm_type == "batch":
        axes = (0, 2, 3)
    else:
        return y
    mean = jnp.mean(y, axis=axes, keepdims=True)
    var = jnp.var(y, axis=axes, keepdims=True)          # biased
    y = (y - mean) * jax.lax.rsqrt(var + eps)
    return y * params["norm_w"].reshape(1, -1, 1, 1) + params["norm_b"].reshape(1, -1, 1, 1)


if __name__ == "__main__":
    root = jax.random.PRNGKey(0)
    kx, kp1, kp2 = jax.random.split(root, 3)

    N, Cin, H, W = 2, 4, 16, 16
    x = jax.random.normal(kx, (N, Cin, H, W), jnp.float32)

    configs = [
        # (params_key, Cout, kernel, stride, norm_type, expected_shape)
        (kp1, 32, 3, 1, "instance", (N, 32, 16, 16)),   # ConvLayer(4, 32, 3, 1)
        (kp2, 64, 7, 2, "instance", (N, 64, 8, 8)),     # ConvLayer(4, 64, 7, 2) downsample
        (kp1, 32, 3, 1, "batch",    (N, 32, 16, 16)),   # ConvLayer(4, 32, 3, 1, 'batch')
    ]
    for key, cout, ksz, stride, ntype, expect in configs:
        p = init_conv_layer_params(key, Cin, cout, ksz, norm_type=ntype)
        fwd = jax.jit(functools.partial(conv_layer_forward, p, stride=stride, norm_type=ntype))
        out = jax.block_until_ready(fwd(x))
        assert out.shape == expect, (out.shape, expect)
        assert bool(jnp.all(jnp.isfinite(out)))
        ref = _reference_forward(p, x, stride=stride, norm_type=ntype)
        err = float(jnp.max(jnp.abs(out - ref)))
        # bf16 MXU operands / bf16 intermediate -> loose tolerance vs. the f32 reference.
        assert err < 0.1, f"max abs err {err} (cout={cout}, k={ksz}, norm={ntype})"

    print("KERNEL_OK")
</pallas_src>

<mosaic_0001>
module attributes {stable_mosaic.version = 11 : i64} {
  func.func @kernel(%arg0: i32, %arg1: i32, %arg2: memref<512x36xbf16, #tpu.memory_space<vmem>>, %arg3: memref<36x128xbf16, #tpu.memory_space<vmem>>, %arg4: memref<512x128xbf16, #tpu.memory_space<vmem>>) attributes {dimension_semantics = [#tpu.dimension_semantics<parallel>, #tpu.dimension_semantics<parallel>], iteration_bounds = array<i64: 1, 1>, scalar_prefetch = 0 : i64, scratch_operands = 0 : i64, tpu.core_type = #tpu.core_type<tc>, window_params = [{transform_indices = @transform_0, window_bounds = array<i64: 512, 36>}, {transform_indices = @transform_1, window_bounds = array<i64: 36, 128>}, {transform_indices = @transform_2, window_bounds = array<i64: 512, 128>}]} {
    %c0 = arith.constant 0 : index
    %c0_0 = arith.constant 0 : index
    %0 = vector.load %arg2[%c0, %c0_0] : memref<512x36xbf16, #tpu.memory_space<vmem>>, vector<512x36xbf16>
    %c0_1 = arith.constant 0 : index
    %c0_2 = arith.constant 0 : index
    %1 = vector.load %arg3[%c0_1, %c0_2] : memref<36x128xbf16, #tpu.memory_space<vmem>>, vector<36x128xbf16>
    %cst = arith.constant dense<0.000000e+00> : vector<512x128xf32>
    %2 = tpu.matmul %0, %1, %cst {dimension_numbers = #tpu.dot_dimension_numbers<[1], [0], [0], [1], [0, 0, 1, 1], [], []>} : vector<512x36xbf16>, vector<36x128xbf16>, vector<512x128xf32> -> vector<512x128xf32>
    %3 = arith.truncf %2 : vector<512x128xf32> to vector<512x128xbf16>
    %c0_3 = arith.constant 0 : index
    %c0_4 = arith.constant 0 : index
    %4 = vector.load %arg4[%c0_3, %c0_4] : memref<512x128xbf16, #tpu.memory_space<vmem>>, vector<512x128xbf16>
    tpu.vector_store %arg4[%c0_3, %c0_4], %3 {strides = array<i32>} : memref<512x128xbf16, #tpu.memory_space<vmem>>, vector<512x128xbf16>,
    return
  }
  func.func @transform_0(%arg0: i32, %arg1: i32) -> (i32, i32) {
    %c0_i32 = arith.constant 0 : i32
    %c0_i32_0 = arith.constant 0 : i32
    return %arg0, %c0_i32 : i32, i32
  }
  func.func @transform_1(%arg0: i32, %arg1: i32) -> (i32, i32) {
    %c0_i32 = arith.constant 0 : i32
    %c0_i32_0 = arith.constant 0 : i32
    return %c0_i32, %arg1 : i32, i32
  }
  func.func @transform_2(%arg0: i32, %arg1: i32) -> (i32, i32) {
    %c0_i32 = arith.constant 0 : i32
    return %arg0, %arg1 : i32, i32
  }
}

module attributes {stable_mosaic.version = 11 : i64} {
  func.func @_norm_stats_kernel(%arg0: i32, %arg1: i32, %arg2: i32, %arg3: memref<1x256x128xbf16, #tpu.memory_space<vmem>>, %arg4: memref<1x1x128xf32, #tpu.memory_space<vmem>>, %arg5: memref<1x1x128xf32, #tpu.memory_space<vmem>>) attributes {dimension_semantics = [#tpu.dimension_semantics<parallel>, #tpu.dimension_semantics<parallel>, #tpu.dimension_semantics<arbitrary>], iteration_bounds = array<i64: 2, 1, 1>, scalar_prefetch = 0 : i64, scratch_operands = 0 : i64, tpu.core_type = #tpu.core_type<tc>, window_params = [{transform_indices = @transform_0, window_bounds = array<i64: 1, 256, 128>}, {transform_indices = @transform_1, window_bounds = array<i64: 1, 1, 128>}, {transform_indices = @transform_2, window_bounds = array<i64: 1, 1, 128>}]} {
    %c0_i32 = arith.constant 0 : i32
    %0 = arith.cmpi eq, %arg2, %c0_i32 : i32
    %1 = arith.extui %0 : i1 to i32
    %c0_i32_0 = arith.constant 0 : i32
    %2 = arith.cmpi ne, %1, %c0_i32_0 : i32
    scf.if %2 {
      %cst_18 = arith.constant 0.000000e+00 : f32
      %19 = vector.broadcast %cst_18 : f32 to vector<1x1x128xf32>
      %c0_19 = arith.constant 0 : index
      %c0_20 = arith.constant 0 : index
      %c0_21 = arith.constant 0 : index
      %20 = vector.load %arg4[%c0_19, %c0_20, %c0_21] : memref<1x1x128xf32, #tpu.memory_space<vmem>>, vector<1x1x128xf32>
      tpu.vector_store %arg4[%c0_19, %c0_20, %c0_21], %19 {strides = array<i32>} : memref<1x1x128xf32, #tpu.memory_space<vmem>>, vector<1x1x128xf32>,
      %cst_22 = arith.constant 0.000000e+00 : f32
      %21 = vector.broadcast %cst_22 : f32 to vector<1x1x128xf32>
      %c0_23 = arith.constant 0 : index
      %c0_24 = arith.constant 0 : index
      %c0_25 = arith.constant 0 : index
      %22 = vector.load %arg5[%c0_23, %c0_24, %c0_25] : memref<1x1x128xf32, #tpu.memory_space<vmem>>, vector<1x1x128xf32>
      tpu.vector_store %arg5[%c0_23, %c0_24, %c0_25], %21 {strides = array<i32>} : memref<1x1x128xf32, #tpu.memory_space<vmem>>, vector<1x1x128xf32>,
    } else {
    }
    %c0 = arith.constant 0 : index
    %c0_1 = arith.constant 0 : index
    %c0_2 = arith.constant 0 : index
    %3 = vector.load %arg3[%c0, %c0_1, %c0_2] : memref<1x256x128xbf16, #tpu.memory_space<vmem>>, vector<1x256x128xbf16>
    %4 = arith.extf %3 : vector<1x256x128xbf16> to vector<1x256x128xf32>
    %c0_3 = arith.constant 0 : index
    %c0_4 = arith.constant 0 : index
    %c0_5 = arith.constant 0 : index
    %5 = vector.load %arg4[%c0_3, %c0_4, %c0_5] : memref<1x1x128xf32, #tpu.memory_space<vmem>>, vector<1x1x128xf32>
    %cst = arith.constant dense<0.000000e+00> : vector<1x128xf32>
    %6 = vector.multi_reduction <add>, %4, %cst [1] : vector<1x256x128xf32> to vector<1x128xf32>
    %7 = vector.shape_cast %6 : vector<1x128xf32> to vector<1x1x128xf32>
    %8 = arith.addf %5, %7 : vector<1x1x128xf32>
    %c0_6 = arith.constant 0 : index
    %c0_7 = arith.constant 0 : index
    %c0_8 = arith.constant 0 : index
    %9 = vector.load %arg4[%c0_6, %c0_7, %c0_8] : memref<1x1x128xf32, #tpu.memory_space<vmem>>, vector<1x1x128xf32>
    tpu.vector_store %arg4[%c0_6, %c0_7, %c0_8], %8 {strides = array<i32>} : memref<1x1x128xf32, #tpu.memory_space<vmem>>, vector<1x1x128xf32>,
    %c0_9 = arith.constant 0 : index
    %c0_10 = arith.constant 0 : index
    %c0_11 = arith.constant 0 : index
    %10 = vector.load %arg5[%c0_9, %c0_10, %c0_11] : memref<1x1x128xf32, #tpu.memory_space<vmem>>, vector<1x1x128xf32>
    %11 = arith.mulf %4, %4 : vector<1x256x128xf32>
    %cst_12 = arith.constant dense<0.000000e+00> : vector<1x128xf32>
    %12 = vector.multi_reduction <add>, %11, %cst_12 [1] : vector<1x256x128xf32> to vector<1x128xf32>
    %13 = vector.shape_cast %12 : vector<1x128xf32> to vector<1x1x128xf32>
    %14 = arith.addf %10, %13 : vector<1x1x128xf32>
    %c0_13 = arith.constant 0 : index
    %c0_14 = arith.constant 0 : index
    %c0_15 = arith.constant 0 : index
    %15 = vector.load %arg5[%c0_13, %c0_14, %c0_15] : memref<1x1x128xf32, #tpu.memory_space<vmem>>, vector<1x1x128xf32>
    tpu.vector_store %arg5[%c0_13, %c0_14, %c0_15], %14 {strides = array<i32>} : memref<1x1x128xf32, #tpu.memory_space<vmem>>, vector<1x1x128xf32>,
    %c0_i32_16 = arith.constant 0 : i32
    %16 = arith.cmpi eq, %arg2, %c0_i32_16 : i32
    %17 = arith.extui %16 : i1 to i32
    %c0_i32_17 = arith.constant 0 : i32
    %18 = arith.cmpi ne, %17, %c0_i32_17 : i32
    scf.if %18 {
      %c0_18 = arith.constant 0 : index
      %c0_19 = arith.constant 0 : index
      %c0_20 = arith.constant 0 : index
      %19 = vector.load %arg4[%c0_18, %c0_19, %c0_20] : memref<1x1x128xf32, #tpu.memory_space<vmem>>, vector<1x1x128xf32>
      %cst_21 = arith.constant 3.906250e-03 : f32
      %20 = vector.broadcast %cst_21 : f32 to vector<1x1x128xf32>
      %21 = arith.mulf %19, %20 : vector<1x1x128xf32>
      %c0_22 = arith.constant 0 : index
      %c0_23 = arith.constant 0 : index
      %c0_24 = arith.constant 0 : index
      %22 = vector.load %arg5[%c0_22, %c0_23, %c0_24] : memref<1x1x128xf32, #tpu.memory_space<vmem>>, vector<1x1x128xf32>
      %cst_25 = arith.constant 3.906250e-03 : f32
      %23 = vector.broadcast %cst_25 : f32 to vector<1x1x128xf32>
      %24 = arith.mulf %22, %23 : vector<1x1x128xf32>
      %25 = arith.mulf %21, %21 : vector<1x1x128xf32>
      %26 = arith.subf %24, %25 : vector<1x1x128xf32>
      %cst_26 = arith.constant 0.000000e+00 : f32
      %27 = vector.broadcast %cst_26 : f32 to vector<1x1x128xf32>
      %28 = arith.maximumf %26, %27 : vector<1x1x128xf32>
      %c0_27 = arith.constant 0 : index
      %c0_28 = arith.constant 0 : index
      %c0_29 = arith.constant 0 : index
      %29 = vector.load %arg4[%c0_27, %c0_28, %c0_29] : memref<1x1x128xf32, #tpu.memory_space<vmem>>, vector<1x1x128xf32>
      tpu.vector_store %arg4[%c0_27, %c0_28, %c0_29], %21 {strides = array<i32>} : memref<1x1x128xf32, #tpu.memory_space<vmem>>, vector<1x1x128xf32>,
      %cst_30 = arith.constant 9.99999974E-6 : f32
      %30 = vector.broadcast %cst_30 : f32 to vector<1x1x128xf32>
      %31 = arith.addf %28, %30 : vector<1x1x128xf32>
      %32 = math.rsqrt %31 : vector<1x1x128xf32>
      %c0_31 = arith.constant 0 : index
      %c0_32 = arith.constant 0 : index
      %c0_33 = arith.constant 0 : index
      %33 = vector.load %arg5[%c0_31, %c0_32, %c0_33] : memref<1x1x128xf32, #tpu.memory_space<vmem>>, vector<1x1x128xf32>
      tpu.vector_store %arg5[%c0_31, %c0_32, %c0_33], %32 {strides = array<i32>} : memref<1x1x128xf32, #tpu.memory_space<vmem>>, vector<1x1x128xf32>,
    } else {
    }
    return
  }
  func.func @transform_0(%arg0: i32, %arg1: i32, %arg2: i32) -> (i32, i32, i32) {
    %c0_i32 = arith.constant 0 : i32
    return %arg0, %arg2, %arg1 : i32, i32, i32
  }
  func.func @transform_1(%arg0: i32, %arg1: i32, %arg2: i32) -> (i32, i32, i32) {
    %c0_i32 = arith.constant 0 : i32
    %c0_i32_0 = arith.constant 0 : i32
    return %arg0, %c0_i32, %arg1 : i32, i32, i32
  }
  func.func @transform_2(%arg0: i32, %arg1: i32, %arg2: i32) -> (i32, i32, i32) {
    %c0_i32 = arith.constant 0 : i32
    %c0_i32_0 = arith.constant 0 : i32
    return %arg0, %c0_i32, %arg1 : i32, i32, i32
  }
}

module attributes {stable_mosaic.version = 11 : i64} {
  func.func @_norm_apply_kernel(%arg0: i32, %arg1: i32, %arg2: i32, %arg3: memref<1x256x128xbf16, #tpu.memory_space<vmem>>, %arg4: memref<1x1x128xf32, #tpu.memory_space<vmem>>, %arg5: memref<1x1x128xf32, #tpu.memory_space<vmem>>, %arg6: memref<1x1x128xf32, #tpu.memory_space<vmem>>, %arg7: memref<1x1x128xf32, #tpu.memory_space<vmem>>, %arg8: memref<1x256x128xf32, #tpu.memory_space<vmem>>) attributes {dimension_semantics = [#tpu.dimension_semantics<parallel>, #tpu.dimension_semantics<parallel>, #tpu.dimension_semantics<parallel>], iteration_bounds = array<i64: 2, 1, 1>, scalar_prefetch = 0 : i64, scratch_operands = 0 : i64, tpu.core_type = #tpu.core_type<tc>, window_params = [{transform_indices = @transform_0, window_bounds = array<i64: 1, 256, 128>}, {transform_indices = @transform_1, window_bounds = array<i64: 1, 1, 128>}, {transform_indices = @transform_2, window_bounds = array<i64: 1, 1, 128>}, {transform_indices = @transform_3, window_bounds = array<i64: 1, 1, 128>}, {transform_indices = @transform_4, window_bounds = array<i64: 1, 1, 128>}, {transform_indices = @transform_5, window_bounds = array<i64: 1, 256, 128>}]} {
    %c0 = arith.constant 0 : index
    %c0_0 = arith.constant 0 : index
    %c0_1 = arith.constant 0 : index
    %0 = vector.load %arg3[%c0, %c0_0, %c0_1] : memref<1x256x128xbf16, #tpu.memory_space<vmem>>, vector<1x256x128xbf16>
    %1 = arith.extf %0 : vector<1x256x128xbf16> to vector<1x256x128xf32>
    %c0_2 = arith.constant 0 : index
    %c0_3 = arith.constant 0 : index
    %c0_4 = arith.constant 0 : index
    %2 = vector.load %arg4[%c0_2, %c0_3, %c0_4] : memref<1x1x128xf32, #tpu.memory_space<vmem>>, vector<1x1x128xf32>
    %3 = vector.broadcast %2 : vector<1x1x128xf32> to vector<1x256x128xf32>
    %4 = arith.subf %1, %3 : vector<1x256x128xf32>
    %c0_5 = arith.constant 0 : index
    %c0_6 = arith.constant 0 : index
    %c0_7 = arith.constant 0 : index
    %5 = vector.load %arg5[%c0_5, %c0_6, %c0_7] : memref<1x1x128xf32, #tpu.memory_space<vmem>>, vector<1x1x128xf32>
    %c0_8 = arith.constant 0 : index
    %c0_9 = arith.constant 0 : index
    %c0_10 = arith.constant 0 : index
    %6 = vector.load %arg6[%c0_8, %c0_9, %c0_10] : memref<1x1x128xf32, #tpu.memory_space<vmem>>, vector<1x1x128xf32>
    %7 = arith.mulf %5, %6 : vector<1x1x128xf32>
    %8 = vector.broadcast %7 : vector<1x1x128xf32> to vector<1x256x128xf32>
    %9 = arith.mulf %4, %8 : vector<1x256x128xf32>
    %c0_11 = arith.constant 0 : index
    %c0_12 = arith.constant 0 : index
    %c0_13 = arith.constant 0 : index
    %10 = vector.load %arg7[%c0_11, %c0_12, %c0_13] : memref<1x1x128xf32, #tpu.memory_space<vmem>>, vector<1x1x128xf32>
    %11 = vector.broadcast %10 : vector<1x1x128xf32> to vector<1x256x128xf32>
    %12 = arith.addf %9, %11 : vector<1x256x128xf32>
    %c0_14 = arith.constant 0 : index
    %c0_15 = arith.constant 0 : index
    %c0_16 = arith.constant 0 : index
    %13 = vector.load %arg8[%c0_14, %c0_15, %c0_16] : memref<1x256x128xf32, #tpu.memory_space<vmem>>, vector<1x256x128xf32>
    tpu.vector_store %arg8[%c0_14, %c0_15, %c0_16], %12 {strides = array<i32>} : memref<1x256x128xf32, #tpu.memory_space<vmem>>, vector<1x256x128xf32>,
    return
  }
  func.func @transform_0(%arg0: i32, %arg1: i32, %arg2: i32) -> (i32, i32, i32) {
    %c0_i32 = arith.constant 0 : i32
    return %arg0, %arg1, %arg2 : i32, i32, i32
  }
  func.func @transform_1(%arg0: i32, %arg1: i32, %arg2: i32) -> (i32, i32, i32) {
    %c0_i32 = arith.constant 0 : i32
    %c0_i32_0 = arith.constant 0 : i32
    return %arg0, %c0_i32, %arg2 : i32, i32, i32
  }
  func.func @transform_2(%arg0: i32, %arg1: i32, %arg2: i32) -> (i32, i32, i32) {
    %c0_i32 = arith.constant 0 : i32
    %c0_i32_0 = arith.constant 0 : i32
    return %arg0, %c0_i32, %arg2 : i32, i32, i32
  }
  func.func @transform_3(%arg0: i32, %arg1: i32, %arg2: i32) -> (i32, i32, i32) {
    %c0_i32 = arith.constant 0 : i32
    %c0_i32_0 = arith.constant 0 : i32
    %c0_i32_1 = arith.constant 0 : i32
    return %c0_i32, %c0_i32_0, %arg2 : i32, i32, i32
  }
  func.func @transform_4(%arg0: i32, %arg1: i32, %arg2: i32) -> (i32, i32, i32) {
    %c0_i32 = arith.constant 0 : i32
    %c0_i32_0 = arith.constant 0 : i32
    %c0_i32_1 = arith.constant 0 : i32
    return %c0_i32, %c0_i32_0, %arg2 : i32, i32, i32
  }
  func.func @transform_5(%arg0: i32, %arg1: i32, %arg2: i32) -> (i32, i32, i32) {
    %c0_i32 = arith.constant 0 : i32
    return %arg0, %arg1, %arg2 : i32, i32, i32
  }
}

</mosaic_0001>

<bundles_post_ra>
// kernel: conv_layer_forward.4
= control target key start
LH: loop header
LB: loop body
LE: loop exit
PB: predicated region body
PF: predicated region fallthrough
CT: control target
= control target key end

     0   :  { %s675_s9 = smov 0   ;;  %s677_s10 = smov 0   ;;  %s743_s0 = inlined_call_operand.vmem [shape: bf16[2,256,128], index: 0, kind: input, shape index: {}]   ;;  %s744_s1 = inlined_call_operand.vmem [shape: f32[2,1,128], index: 1, kind: output, shape index: {0}]   ;;  %s745_s2 = inlined_call_operand.vmem [shape: f32[2,1,128], index: 2, kind: output, shape index: {1}]  }
   0x1   :  { %s679_s11 = smov 0  }
   0x2 LB: > { %s32_s12 = sadd.s32 1, %s653_s10  ;;  %p523_p0 = scmp.ge.s32.totalorder %s657_s11, 1  ;;  %s657_s11 = sphi %s679_s11, %s13_s11   ;;  %s653_s10 = sphi %s677_s10, %s747_s10   ;;  %s649_s9 = sphi %s675_s9, %s746_s9  }
   0x3   : > { %p34_p1 = scmp.ge.s32.totalorder %s32_s12, 2  ;;  %p150_p2 = scmp.lt.s32.totalorder %s657_s11, 3 }
   0x5   : > { %s749_s12 = smov (%p34_p1, %s32_s12), 0  ;;  %p151_p3 = pnand %p523_p0, %p150_p2 }
   0x6   : > { %p187_p4 = scmp.lt.s32.totalorder (!%p151_p3), %s649_s9, 1  ;;  %v659_v0 = vmov (!%p151_p3), 0.0  }
   0x7   : > { %154 = sbr.rel (%p151_p3) target bundleno = 126 (0x7e), region = 24 }
   0xe   : > { %s751_s9 = smov (!%p187_p4, %s649_s9), 1 }
   0xf   : > { %s528_s13 = sshll.u32 %s751_s9, 7  ;;  %s696_s16 = scalar_lea.vmem %s744_s1, %s751_s9 }
  0x10   : > { %s701_s19 = scalar_lea.vmem %s743_s0, %s528_s13  ;;  %215 = vst [vmem:[%s696_s16] sm:$0x1] %v659_v0  ;;  %s707_s22 = scalar_lea.vmem %s745_s2, %s751_s9 }
  0x11   : > { %216 = vst [vmem:[%s707_s22] sm:$0x1] %v659_v0  ;;  %v530_v1 = vld [vmem:[%s701_s19] sm:$0xff]   ;;  %v593_v2 = vld [vmem:[%s701_s19 + $0x8] sm:$0xff]   ;;  %v594_v6 = vld [vmem:[%s701_s19 + $0x10] sm:$0xff]  }
  0x12   : > { %v531_v3 = vunpack.c.l.bf16 %v530_v1  ;;  %v532_v4 = vunpack.c.h.bf16 %v530_v1  ;;  %v535_v5 = vunpack.c.l.bf16 %v593_v2  ;;  %v536_v7 = vunpack.c.h.bf16 %v593_v2  ;;  %v595_v11 = vld [vmem:[%s701_s19 + $0x18] sm:$0xff]   ;;  %v596_v18 = vld [vmem:[%s701_s19 + $0x20] sm:$0xff]   ;;  %v597_v26 = vld [vmem:[%s701_s19 + $0x28] sm:$0xff]  }
  0x13   : > { %v539_v9 = vunpack.c.l.bf16 %v594_v6  ;;  %v540_v12 = vunpack.c.h.bf16 %v594_v6  ;;  %v543_v16 = vunpack.c.l.bf16 %v595_v11  ;;  %v544_v20 = vunpack.c.h.bf16 %v595_v11  ;;  %v598_v35 = vld [vmem:[%s701_s19 + $0x30] sm:$0xff]   ;;  %v599_v44 = vld [vmem:[%s701_s19 + $0x38] sm:$0xff]   ;;  %v600_v53 = vld [vmem:[%s701_s19 + $0x40] sm:$0xff]  }
  0x14   : > { %v282_v8 = vadd.f32 %v532_v4, %v531_v3  ;;  %v322_v14 = vmul.f32 %v531_v3, %v531_v3  ;;  %v323_v15 = vmul.f32 %v532_v4, %v532_v4  ;;  %v324_v19 = vmul.f32 %v535_v5, %v535_v5  ;;  %v601_v62 = vld [vmem:[%s701_s19 + $0x48] sm:$0xff]  }
  0x15   : > { %v325_v22 = vmul.f32 %v536_v7, %v536_v7  ;;  %v547_v24 = vunpack.c.l.bf16 %v596_v18  ;;  %v326_v27 = vmul.f32 %v539_v9, %v539_v9  ;;  %v548_v29 = vunpack.c.h.bf16 %v596_v18 }
  0x16   : > { %v283_v10 = vadd.f32 %v535_v5, %v282_v8  ;;  %v354_v23 = vadd.f32 %v323_v15, %v322_v14  ;;  %v327_v31 = vmul.f32 %v540_v12, %v540_v12  ;;  %v551_v33 = vunpack.c.l.bf16 %v597_v26 }
  0x17   : > { %v328_v36 = vmul.f32 %v543_v16, %v543_v16  ;;  %v552_v38 = vunpack.c.h.bf16 %v597_v26  ;;  %v329_v40 = vmul.f32 %v544_v20, %v544_v20  ;;  %v555_v42 = vunpack.c.l.bf16 %v598_v35 }
  0x18   : > { %v284_v13 = vadd.f32 %v536_v7, %v283_v10  ;;  %v355_v28 = vadd.f32 %v354_v23, %v324_v19  ;;  %v330_v45 = vmul.f32 %v547_v24, %v547_v24  ;;  %v556_v47 = vunpack.c.h.bf16 %v598_v35  ;;  %v602_v7 = vld [vmem:[%s701_s19 + $0x50] sm:$0xff]  }
  0x19   : > { %v331_v49 = vmul.f32 %v548_v29, %v548_v29  ;;  %v559_v51 = vunpack.c.l.bf16 %v599_v44  ;;  %v332_v54 = vmul.f32 %v551_v33, %v551_v33  ;;  %v560_v56 = vunpack.c.h.bf16 %v599_v44 }
  0x1a   : > { %v285_v17 = vadd.f32 %v539_v9, %v284_v13  ;;  %v356_v32 = vadd.f32 %v355_v28, %v325_v22  ;;  %v333_v58 = vmul.f32 %v552_v38, %v552_v38  ;;  %v563_v60 = vunpack.c.l.bf16 %v600_v53 }
  0x1b   : > { %v334_v63 = vmul.f32 %v555_v42, %v555_v42  ;;  %v564_v1 = vunpack.c.h.bf16 %v600_v53  ;;  %v335_v3 = vmul.f32 %v556_v47, %v556_v47  ;;  %v567_v5 = vunpack.c.l.bf16 %v601_v62 }
  0x1c   : > { %v286_v21 = vadd.f32 %v540_v12, %v285_v17  ;;  %v357_v37 = vadd.f32 %v356_v32, %v326_v27  ;;  %v336_v8 = vmul.f32 %v559_v51, %v559_v51  ;;  %v568_v10 = vunpack.c.h.bf16 %v601_v62 }
  0x1d   : > { %v337_v12 = vmul.f32 %v560_v56, %v560_v56  ;;  %v571_v14 = vunpack.c.l.bf16 %v602_v7  ;;  %v338_v17 = vmul.f32 %v563_v60, %v563_v60  ;;  %v572_v19 = vunpack.c.h.bf16 %v602_v7 }
  0x1e   : > { %v287_v25 = vadd.f32 %v543_v16, %v286_v21  ;;  %v358_v41 = vadd.f32 %v357_v37, %v327_v31  ;;  %v603_v16 = vld [vmem:[%s701_s19 + $0x58] sm:$0xff]   ;;  %v339_v21 = vmul.f32 %v564_v1, %v564_v1  ;;  %v340_v26 = vmul.f32 %v567_v5, %v567_v5 }
  0x1f   : > { %v575_v23 = vunpack.c.l.bf16 %v603_v16  ;;  %v576_v28 = vunpack.c.h.bf16 %v603_v16  ;;  %v342_v35 = vmul.f32 %v571_v14, %v571_v14 }
  0x20   : > { %v288_v30 = vadd.f32 %v544_v20, %v287_v25  ;;  %v359_v46 = vadd.f32 %v358_v41, %v328_v36  ;;  %v604_v25 = vld [vmem:[%s701_s19 + $0x60] sm:$0xff]  }
  0x21   : > { %v579_v32 = vunpack.c.l.bf16 %v604_v25  ;;  %v580_v37 = vunpack.c.h.bf16 %v604_v25  ;;  %v344_v44 = vmul.f32 %v575_v23, %v575_v23 }
  0x22   : > { %v289_v34 = vadd.f32 %v547_v24, %v288_v30  ;;  %v360_v50 = vadd.f32 %v359_v46, %v329_v40  ;;  %v341_v30 = vmul.f32 %v568_v10, %v568_v10 }
  0x23   : > { %v346_v53 = vmul.f32 %v579_v32, %v579_v32 }
  0x24   : > { %v290_v39 = vadd.f32 %v548_v29, %v289_v34  ;;  %v361_v55 = vadd.f32 %v360_v50, %v330_v45  ;;  %v605_v34 = vld [vmem:[%s701_s19 + $0x68] sm:$0xff]  }
  0x25   : > { %v583_v41 = vunpack.c.l.bf16 %v605_v34  ;;  %v584_v46 = vunpack.c.h.bf16 %v605_v34 }
  0x26   : > { %v291_v43 = vadd.f32 %v551_v33, %v290_v39  ;;  %v362_v59 = vadd.f32 %v361_v55, %v331_v49  ;;  %v343_v39 = vmul.f32 %v572_v19, %v572_v19 }
  0x28   : > { %v292_v48 = vadd.f32 %v552_v38, %v291_v43  ;;  %v363_v0 = vadd.f32 %v362_v59, %v332_v54  ;;  %v606_v43 = vld [vmem:[%s701_s19 + $0x70] sm:$0xff]  }
  0x29   : > { %v587_v50 = vunpack.c.l.bf16 %v606_v43  ;;  %v588_v55 = vunpack.c.h.bf16 %v606_v43 }
  0x2a   : > { %v293_v52 = vadd.f32 %v555_v42, %v292_v48  ;;  %v364_v4 = vadd.f32 %v363_v0, %v333_v58  ;;  %v345_v48 = vmul.f32 %v576_v28, %v576_v28 }
  0x2b   : > { %v351_v7 = vmul.f32 %v588_v55, %v588_v55 }
  0x2c   : > { %v294_v57 = vadd.f32 %v556_v47, %v293_v52  ;;  %v365_v9 = vadd.f32 %v364_v4, %v334_v63  ;;  %v607_v52 = vld [vmem:[%s701_s19 + $0x78] sm:$0xff]   ;;  %v350_v4 = vmul.f32 %v587_v50, %v587_v50 }
  0x2d   : > { %v591_v59 = vunpack.c.l.bf16 %v607_v52  ;;  %v592_v63 = vunpack.c.h.bf16 %v607_v52 }
  0x2e   : > { %v295_v61 = vadd.f32 %v559_v51, %v294_v57  ;;  %v366_v13 = vadd.f32 %v365_v9, %v335_v3  ;;  %v347_v57 = vmul.f32 %v580_v37, %v580_v37 }
  0x30   : > { %v296_v2 = vadd.f32 %v560_v56, %v295_v61  ;;  %v367_v18 = vadd.f32 %v366_v13, %v336_v8  ;;  %v348_v61 = vmul.f32 %v583_v41, %v583_v41  ;;  %v353_v13 = vmul.f32 %v592_v63, %v592_v63 }
  0x32   : > { %v297_v6 = vadd.f32 %v563_v60, %v296_v2  ;;  %v368_v22 = vadd.f32 %v367_v18, %v337_v12 }
  0x34   : > { %v298_v11 = vadd.f32 %v564_v1, %v297_v6  ;;  %v369_v27 = vadd.f32 %v368_v22, %v338_v17  ;;  %v349_v1 = vmul.f32 %v584_v46, %v584_v46 }
  0x36   : > { %v299_v15 = vadd.f32 %v567_v5, %v298_v11  ;;  %v370_v31 = vadd.f32 %v369_v27, %v339_v21 }
  0x38   : > { %v300_v20 = vadd.f32 %v568_v10, %v299_v15  ;;  %v371_v36 = vadd.f32 %v370_v31, %v340_v26  ;;  %v352_v10 = vmul.f32 %v591_v59, %v591_v59 }
  0x3a   : > { %v301_v24 = vadd.f32 %v571_v14, %v300_v20  ;;  %v372_v40 = vadd.f32 %v371_v36, %v341_v30  ;;  %v281_v20 = vld [vmem:[%s696_s16] sm:$0x1] }
  0x3c   : > { %v302_v29 = vadd.f32 %v572_v19, %v301_v24  ;;  %v373_v45 = vadd.f32 %v372_v40, %v342_v35 }
  0x3e   : > { %v303_v33 = vadd.f32 %v575_v23, %v302_v29  ;;  %v374_v49 = vadd.f32 %v373_v45, %v343_v39 }
  0x40   : > { %v304_v38 = vadd.f32 %v576_v28, %v303_v33  ;;  %v375_v54 = vadd.f32 %v374_v49, %v344_v44  ;;  %v321_v28 = vld [vmem:[%s707_s22] sm:$0x1] }
  0x42   : > { %v305_v42 = vadd.f32 %v579_v32, %v304_v38  ;;  %v376_v58 = vadd.f32 %v375_v54, %v345_v48 }
  0x44   : > { %v306_v47 = vadd.f32 %v580_v37, %v305_v42  ;;  %v377_v62 = vadd.f32 %v376_v58, %v346_v53 }
  0x46   : > { %v307_v51 = vadd.f32 %v583_v41, %v306_v47  ;;  %v378_v2 = vadd.f32 %v377_v62, %v347_v57 }
  0x48   : > { %v308_v56 = vadd.f32 %v584_v46, %v307_v51  ;;  %v379_v5 = vadd.f32 %v378_v2, %v348_v61 }
  0x4a   : > { %v309_v60 = vadd.f32 %v587_v50, %v308_v56  ;;  %v380_v8 = vadd.f32 %v379_v5, %v349_v1 }
  0x4c   : > { %v310_v0 = vadd.f32 %v588_v55, %v309_v60  ;;  %v381_v11 = vadd.f32 %v380_v8, %v350_v4 }
  0x4e   : > { %v311_v3 = vadd.f32 %v591_v59, %v310_v0  ;;  %v382_v14 = vadd.f32 %v381_v11, %v351_v7 }
  0x50   : > { %v312_v6 = vadd.f32 %v592_v63, %v311_v3  ;;  %v383_v16 = vadd.f32 %v382_v14, %v352_v10 }
  0x52   : > { %v313_v9 = vrot.slane %v312_v6, 4  ;;  %v384_v18 = vadd.f32 %v383_v16, %v353_v13 }
  0x54   : > { %v314_v12 = vadd.f32 %v313_v9, %v312_v6  ;;  %v385_v21 = vrot.slane %v384_v18, 4 }
  0x56   : > { %v315_v15 = vrot.slane %v314_v12, 2  ;;  %v386_v23 = vadd.f32 %v385_v21, %v384_v18 }
  0x58   : > { %v316_v17 = vadd.f32 %v315_v15, %v314_v12  ;;  %v387_v25 = vrot.slane %v386_v23, 2 }
  0x5a   : > { %v317_v19 = vrot.slane %v316_v17, 1  ;;  %v388_v26 = vadd.f32 %v387_v25, %v386_v23 }
  0x5c   : > { %v318_v22 = vadd.f32 %v317_v19, %v316_v17  ;;  %v389_v27 = vrot.slane %v388_v26, 1 }
  0x5e   : > { %v319_v24 = vadd.f32 %v318_v22, %v281_v20  ;;  %v390_v29 = vadd.f32 %v389_v27, %v388_v26 }
  0x60   : > { %320 = vst [vmem:[%s696_s16] sm:$0x1] %v319_v24  ;;  %v391_v30 = vadd.f32 %v390_v29, %v321_v28 }
  0x62   : > { %392 = vst [vmem:[%s707_s22] sm:$0x1] %v391_v30 }
  0x67   : > { %v396_v31 = vld [vmem:[%s696_s16] sm:$0x1] }
  0x68   : > { %v397_v32 = vmul.f32 0.00390625, %v396_v31 }
  0x69   : > { %v398_v34 = vld [vmem:[%s707_s22] sm:$0x1] }
  0x6a   : > { %403 = vst [vmem:[%s696_s16] sm:$0x1] %v397_v32  ;;  %v400_v33 = vmul.f32 %v397_v32, %v397_v32  ;;  %v399_v35 = vmul.f32 0.00390625, %v398_v34 }
  0x6c   : > { %v401_v36 = vsub.f32 %v399_v35, %v400_v33 }
  0x6e   : > { %v402_v37 = vmax.f32 %v401_v36, 0.0 }
  0x70   : > { %v404_v38 = vadd.f32 1e-05, %v402_v37 }
  0x72   : > { %633 = vrsqrt.f32 %v404_v38 }
  0x7c   : > { %v634_v39 = vpop.eup %633 }
  0x7d   : > { %406 = vst [vmem:[%s707_s22] sm:$0x1] %v634_v39 }
  0x7e PF: > { %s13_s11 = sadd.s32 1, %s657_s11   ;;  %s746_s9 = smov %s653_s10 }
  0x7f   : > { %p10_p5 = scmp.ge.s32.totalorder %s13_s11, 4   ;;  %s747_s10 = smov %s749_s12 }
  0x81   :  { %12 = sbr.rel (!%p10_p5) target bundleno = 2 (0x2), region = 74 }

// kernel: conv_layer_forward.3
= control target key start
LH: loop header
LB: loop body
LE: loop exit
PB: predicated region body
PF: predicated region fallthrough
CT: control target
= control target key end

     0   :  { %vm256_vm0 = vcmask 293888   ;;  %vm353_vm1 = vcmask 1041408   ;;  %s1752_s1 = inlined_call_operand.vmem [shape: bf16[36,128], index: 1, kind: input, shape index: {}]   ;;  %s1753_s0 = inlined_call_operand.vmem [shape: bf16[512,36], index: 0, kind: input, shape index: {}]   ;;  %s1754_s2 = inlined_call_operand.vmem [shape: bf16[512,128], index: 2, kind: output, shape index: {}]  }
   0x1   :  { %v1469_v0 = vld [vmem:[%s1752_s1] sm:$0xff]   ;;  %v1470_v1 = vld [vmem:[%s1752_s1 + $0x8] sm:$0xff]   ;;  %v1471_v2 = vld [vmem:[%s1752_s1 + $0x10] ss:$0 sps:$4 sm:$0x33]  }
   0x2   :  { %1391 = vmatprep.subr.bf16.mxu0 %v1469_v0  ;;  %1461 = vmatprep.subr.bf16.mxu1 %v1469_v0  ;;  %v1472_v3 = vld [vmem:[%s1753_s0] sm:$0xff]   ;;  %v355_v5 = vsel %vm353_vm1, %v1471_v2, 0  ;;  %v1474_v6 = vld [vmem:[%s1753_s0 + $0x8] sm:$0xff]   ;;  %v1476_v8 = vld [vmem:[%s1753_s0 + $0x10] sm:$0xff]  }
   0x3   :  { %1392 = vmatpush3.bf16.msra.mxu0 %v1469_v0  ;;  %1464 = vmatpush3.bf16.msra.mxu1 %v1469_v0  ;;  %v1473_v4 = vld [vmem:[%s1753_s0 + $0x80] sm:$0xff]   ;;  %v1475_v7 = vld [vmem:[%s1753_s0 + $0x88] sm:$0xff]   ;;  %v1477_v9 = vld [vmem:[%s1753_s0 + $0x90] sm:$0xff]  }
   0x4   :  { %1393 = vmatprep.subr.bf16.mxu0 %v1470_v1  ;;  %1462 = vmatprep.subr.bf16.mxu1 %v1470_v1  ;;  %v1478_v10 = vld [vmem:[%s1753_s0 + $0x18] sm:$0xff]   ;;  %v1480_v12 = vld [vmem:[%s1753_s0 + $0x20] sm:$0xff]   ;;  %v1482_v14 = vld [vmem:[%s1753_s0 + $0x28] sm:$0xff]  }
   0x5   :  { %1397 = vmatprep.mubr.msk.bf16.mxu0 %vm256_vm0, %v1472_v3  ;;  %1429 = vmatprep.mubr.msk.bf16.mxu1 %vm256_vm0, %v1473_v4  ;;  %v1479_v11 = vld [vmem:[%s1753_s0 + $0x98] sm:$0xff]   ;;  %v1481_v13 = vld [vmem:[%s1753_s0 + $0xa0] sm:$0xff]   ;;  %v1483_v15 = vld [vmem:[%s1753_s0 + $0xa8] sm:$0xff]  }
   0x6   :  { %v1484_v16 = vld [vmem:[%s1753_s0 + $0x30] sm:$0xff]   ;;  %v1486_v18 = vld [vmem:[%s1753_s0 + $0x38] sm:$0xff]   ;;  %v1488_v20 = vld [vmem:[%s1753_s0 + $0x40] sm:$0xff]  }
   0x7   :  { %1394 = vmatpush3.bf16.msra.mxu0 %v1470_v1  ;;  %1465 = vmatpush3.bf16.msra.mxu1 %v1470_v1  ;;  %v1485_v17 = vld [vmem:[%s1753_s0 + $0xb0] sm:$0xff]   ;;  %v1487_v19 = vld [vmem:[%s1753_s0 + $0xb8] sm:$0xff]   ;;  %v1489_v21 = vld [vmem:[%s1753_s0 + $0xc0] sm:$0xff]  }
   0x8   :  { %1467 = vmatprep.subr.msk.bf16.mxu0 %vm353_vm1, %v1471_v2  ;;  %1468 = vmatprep.subr.msk.bf16.mxu1 %vm353_vm1, %v1471_v2  ;;  %v1490_v22 = vld [vmem:[%s1753_s0 + $0x48] sm:$0xff]   ;;  %v1492_v24 = vld [vmem:[%s1753_s0 + $0x50] sm:$0xff]   ;;  %v1494_v26 = vld [vmem:[%s1753_s0 + $0x58] sm:$0xff]  }
   0x9   :  { %v1491_v23 = vld [vmem:[%s1753_s0 + $0xc8] sm:$0xff]   ;;  %v1493_v25 = vld [vmem:[%s1753_s0 + $0xd0] sm:$0xff]   ;;  %v1495_v27 = vld [vmem:[%s1753_s0 + $0xd8] sm:$0xff]  }
   0xa   :  { %v1496_v28 = vld [vmem:[%s1753_s0 + $0x60] sm:$0xff]   ;;  %v1498_v30 = vld [vmem:[%s1753_s0 + $0x68] sm:$0xff]   ;;  %v1500_v32 = vld [vmem:[%s1753_s0 + $0x70] sm:$0xff]  }
   0xb   :  { %1396 = vmatpush3.bf16.msra.mxu0 %v355_v5  ;;  %1466 = vmatpush3.bf16.msra.mxu1 %v355_v5  ;;  %v1497_v29 = vld [vmem:[%s1753_s0 + $0xe0] sm:$0xff]   ;;  %v1499_v31 = vld [vmem:[%s1753_s0 + $0xe8] sm:$0xff]   ;;  %v1501_v33 = vld [vmem:[%s1753_s0 + $0xf0] sm:$0xff]  }
   0xc   :  { %v1502_v34 = vld [vmem:[%s1753_s0 + $0x78] sm:$0xff]  }
   0xd   :  { %v1503_v35 = vld [vmem:[%s1753_s0 + $0xf8] sm:$0xff]  }
   0xe   :  { %1398 = vmatmul.mubr.msk.bf16.vlgmr.msra.gmra.mrb[0].mxu0 %vm256_vm0, %v1474_v6  ;;  %1430 = vmatmul.mubr.msk.bf16.vlgmr.msra.gmra.mrb[0].mxu1 %vm256_vm0, %v1475_v7 }
   0xf   :  { %1401 = vmatprep.mubr.msk.bf16.mxu0 %vm256_vm0, %v1476_v8  ;;  %1433 = vmatprep.mubr.msk.bf16.mxu1 %vm256_vm0, %v1477_v9 }
  0x16   :  { %1402 = vmatmul.mubr.msk.bf16.gmra.mrb[4].mxu0 %vm256_vm0, %v1478_v10  ;;  %1434 = vmatmul.mubr.msk.bf16.gmra.mrb[4].mxu1 %vm256_vm0, %v1479_v11 }
  0x17   :  { %1405 = vmatprep.mubr.msk.bf16.mxu0 %vm256_vm0, %v1480_v12  ;;  %1437 = vmatprep.mubr.msk.bf16.mxu1 %vm256_vm0, %v1481_v13 }
  0x1e   :  { %1406 = vmatmul.mubr.msk.bf16.gmra.mrb[8].mxu0 %vm256_vm0, %v1482_v14  ;;  %1438 = vmatmul.mubr.msk.bf16.gmra.mrb[8].mxu1 %vm256_vm0, %v1483_v15 }
  0x1f   :  { %1409 = vmatprep.mubr.msk.bf16.mxu0 %vm256_vm0, %v1484_v16  ;;  %1441 = vmatprep.mubr.msk.bf16.mxu1 %vm256_vm0, %v1485_v17 }
  0x26   :  { %1410 = vmatmul.mubr.msk.bf16.gmra.mrb[12].mxu0 %vm256_vm0, %v1486_v18  ;;  %1442 = vmatmul.mubr.msk.bf16.gmra.mrb[12].mxu1 %vm256_vm0, %v1487_v19 }
  0x27   :  { %1413 = vmatprep.mubr.msk.bf16.mxu0 %vm256_vm0, %v1488_v20  ;;  %1445 = vmatprep.mubr.msk.bf16.mxu1 %vm256_vm0, %v1489_v21 }
  0x2e   :  { %1414 = vmatmul.mubr.msk.bf16.gmra.mrb[16].mxu0 %vm256_vm0, %v1490_v22  ;;  %1446 = vmatmul.mubr.msk.bf16.gmra.mrb[16].mxu1 %vm256_vm0, %v1491_v23 }
  0x2f   :  { %1417 = vmatprep.mubr.msk.bf16.mxu0 %vm256_vm0, %v1492_v24  ;;  %1449 = vmatprep.mubr.msk.bf16.mxu1 %vm256_vm0, %v1493_v25 }
  0x36   :  { %1418 = vmatmul.mubr.msk.bf16.gmra.mrb[20].mxu0 %vm256_vm0, %v1494_v26  ;;  %1450 = vmatmul.mubr.msk.bf16.gmra.mrb[20].mxu1 %vm256_vm0, %v1495_v27 }
  0x37   :  { %1421 = vmatprep.mubr.msk.bf16.mxu0 %vm256_vm0, %v1496_v28  ;;  %1453 = vmatprep.mubr.msk.bf16.mxu1 %vm256_vm0, %v1497_v29 }
  0x3e   :  { %1422 = vmatmul.mubr.msk.bf16.gmra.mrb[24].mxu0 %vm256_vm0, %v1498_v30  ;;  %1454 = vmatmul.mubr.msk.bf16.gmra.mrb[24].mxu1 %vm256_vm0, %v1499_v31 }
  0x3f   :  { %1425 = vmatprep.mubr.msk.bf16.mxu0 %vm256_vm0, %v1500_v32  ;;  %1457 = vmatprep.mubr.msk.bf16.mxu1 %vm256_vm0, %v1501_v33 }
  0x46   :  { %1426 = vmatmul.mubr.msk.bf16.gmra.mrb[28].mxu0 %vm256_vm0, %v1502_v34  ;;  %1458 = vmatmul.mubr.msk.bf16.gmra.mrb[28].mxu1 %vm256_vm0, %v1503_v35 }
  0xe1   :  { %v1399_v36 = vpop.f32.mrb[0].mxu0  ;;  %v1431_v37 = vpop.f32.mrb[0].mxu1 }
  0xe2   :  { %v391_v38 = vpop.f32.mrb[1].mxu0  ;;  %v519_v39 = vpop.f32.mrb[1].mxu1 }
  0xe3   :  { %v1400_v40 = vpop.f32.mrb[2].mxu0  ;;  %v1432_v41 = vpop.f32.mrb[2].mxu1 }
  0xe4   :  { %v1173_v42 = vpack.c.bf16 %v1400_v40, %v1399_v36  ;;  %v1253_v43 = vpack.c.bf16 %v1432_v41, %v1431_v37  ;;  %v394_v44 = vpop.f32.mrb[3].mxu0  ;;  %v522_v45 = vpop.f32.mrb[3].mxu1 }
  0xe5   :  { %v1168_v46 = vpack.c.bf16 %v394_v44, %v391_v38  ;;  %v1248_v47 = vpack.c.bf16 %v522_v45, %v519_v39 }
  0xe6   :  { %1325 = vst [vmem:[%s1754_s2 + $0x8] sm:$0xff] %v1173_v42   ;;  %1341 = vst [vmem:[%s1754_s2 + $0x88] sm:$0xff] %v1253_v43  }
  0xe7   :  { %1169 = vst [vmem:[%s1754_s2] sm:$0xff] %v1168_v46   ;;  %1340 = vst [vmem:[%s1754_s2 + $0x80] sm:$0xff] %v1248_v47  }
  0xe9   :  { %v1403_v48 = vpop.f32.mrb[4].mxu0  ;;  %v1435_v49 = vpop.f32.mrb[4].mxu1 }
  0xea   :  { %v407_v50 = vpop.f32.mrb[5].mxu0  ;;  %v535_v51 = vpop.f32.mrb[5].mxu1 }
  0xeb   :  { %v1404_v52 = vpop.f32.mrb[6].mxu0  ;;  %v1436_v53 = vpop.f32.mrb[6].mxu1 }
  0xec   :  { %v1183_v54 = vpack.c.bf16 %v1404_v52, %v1403_v48  ;;  %v1263_v55 = vpack.c.bf16 %v1436_v53, %v1435_v49  ;;  %v410_v56 = vpop.f32.mrb[7].mxu0  ;;  %v538_v57 = vpop.f32.mrb[7].mxu1 }
  0xed   :  { %v1178_v58 = vpack.c.bf16 %v410_v56, %v407_v50  ;;  %v1258_v59 = vpack.c.bf16 %v538_v57, %v535_v51 }
  0xee   :  { %1327 = vst [vmem:[%s1754_s2 + $0x18] sm:$0xff] %v1183_v54   ;;  %1343 = vst [vmem:[%s1754_s2 + $0x98] sm:$0xff] %v1263_v55  }
  0xef   :  { %1326 = vst [vmem:[%s1754_s2 + $0x10] sm:$0xff] %v1178_v58   ;;  %1342 = vst [vmem:[%s1754_s2 + $0x90] sm:$0xff] %v1258_v59  }
  0xf1   :  { %v1407_v60 = vpop.f32.mrb[8].mxu0  ;;  %v1439_v61 = vpop.f32.mrb[8].mxu1 }
  0xf2   :  { %v423_v62 = vpop.f32.mrb[9].mxu0  ;;  %v551_v63 = vpop.f32.mrb[9].mxu1 }
  0xf3   :  { %v1408_v0 = vpop.f32.mrb[10].mxu0  ;;  %v1440_v1 = vpop.f32.mrb[10].mxu1 }
  0xf4   :  { %v1193_v2 = vpack.c.bf16 %v1408_v0, %v1407_v60  ;;  %v1273_v3 = vpack.c.bf16 %v1440_v1, %v1439_v61  ;;  %v426_v4 = vpop.f32.mrb[11].mxu0  ;;  %v554_v5 = vpop.f32.mrb[11].mxu1 }
  0xf5   :  { %v1188_v6 = vpack.c.bf16 %v426_v4, %v423_v62  ;;  %v1268_v7 = vpack.c.bf16 %v554_v5, %v551_v63 }
  0xf6   :  { %1329 = vst [vmem:[%s1754_s2 + $0x28] sm:$0xff] %v1193_v2   ;;  %1345 = vst [vmem:[%s1754_s2 + $0xa8] sm:$0xff] %v1273_v3  }
  0xf7   :  { %1328 = vst [vmem:[%s1754_s2 + $0x20] sm:$0xff] %v1188_v6   ;;  %1344 = vst [vmem:[%s1754_s2 + $0xa0] sm:$0xff] %v1268_v7  }
  0xf9   :  { %v1411_v8 = vpop.f32.mrb[12].mxu0  ;;  %v1443_v9 = vpop.f32.mrb[12].mxu1 }
  0xfa   :  { %v439_v10 = vpop.f32.mrb[13].mxu0  ;;  %v567_v11 = vpop.f32.mrb[13].mxu1 }
  0xfb   :  { %v1412_v12 = vpop.f32.mrb[14].mxu0  ;;  %v1444_v13 = vpop.f32.mrb[14].mxu1 }
  0xfc   :  { %v1203_v14 = vpack.c.bf16 %v1412_v12, %v1411_v8  ;;  %v1283_v15 = vpack.c.bf16 %v1444_v13, %v1443_v9  ;;  %v442_v16 = vpop.f32.mrb[15].mxu0  ;;  %v570_v17 = vpop.f32.mrb[15].mxu1 }
  0xfd   :  { %v1198_v18 = vpack.c.bf16 %v442_v16, %v439_v10  ;;  %v1278_v19 = vpack.c.bf16 %v570_v17, %v567_v11 }
  0xfe   :  { %1331 = vst [vmem:[%s1754_s2 + $0x38] sm:$0xff] %v1203_v14   ;;  %1347 = vst [vmem:[%s1754_s2 + $0xb8] sm:$0xff] %v1283_v15  }
  0xff   :  { %1330 = vst [vmem:[%s1754_s2 + $0x30] sm:$0xff] %v1198_v18   ;;  %1346 = vst [vmem:[%s1754_s2 + $0xb0] sm:$0xff] %v1278_v19  }
 0x101   :  { %v1415_v20 = vpop.f32.mrb[16].mxu0  ;;  %v1447_v21 = vpop.f32.mrb[16].mxu1 }
 0x102   :  { %v455_v22 = vpop.f32.mrb[17].mxu0  ;;  %v583_v23 = vpop.f32.mrb[17].mxu1 }
 0x103   :  { %v1416_v24 = vpop.f32.mrb[18].mxu0  ;;  %v1448_v25 = vpop.f32.mrb[18].mxu1 }
 0x104   :  { %v1213_v26 = vpack.c.bf16 %v1416_v24, %v1415_v20  ;;  %v1293_v27 = vpack.c.bf16 %v1448_v25, %v1447_v21  ;;  %v458_v28 = vpop.f32.mrb[19].mxu0  ;;  %v586_v29 = vpop.f32.mrb[19].mxu1 }
 0x105   :  { %v1208_v30 = vpack.c.bf16 %v458_v28, %v455_v22  ;;  %v1288_v31 = vpack.c.bf16 %v586_v29, %v583_v23 }
 0x106   :  { %1333 = vst [vmem:[%s1754_s2 + $0x48] sm:$0xff] %v1213_v26   ;;  %1349 = vst [vmem:[%s1754_s2 + $0xc8] sm:$0xff] %v1293_v27  }
 0x107   :  { %1332 = vst [vmem:[%s1754_s2 + $0x40] sm:$0xff] %v1208_v30   ;;  %1348 = vst [vmem:[%s1754_s2 + $0xc0] sm:$0xff] %v1288_v31  }
 0x109   :  { %v1419_v32 = vpop.f32.mrb[20].mxu0  ;;  %v1451_v33 = vpop.f32.mrb[20].mxu1 }
 0x10a   :  { %v471_v34 = vpop.f32.mrb[21].mxu0  ;;  %v599_v35 = vpop.f32.mrb[21].mxu1 }
 0x10b   :  { %v1420_v36 = vpop.f32.mrb[22].mxu0  ;;  %v1452_v37 = vpop.f32.mrb[22].mxu1 }
 0x10c   :  { %v1223_v38 = vpack.c.bf16 %v1420_v36, %v1419_v32  ;;  %v1303_v39 = vpack.c.bf16 %v1452_v37, %v1451_v33  ;;  %v474_v40 = vpop.f32.mrb[23].mxu0  ;;  %v602_v41 = vpop.f32.mrb[23].mxu1 }
 0x10d   :  { %v1218_v42 = vpack.c.bf16 %v474_v40, %v471_v34  ;;  %v1298_v43 = vpack.c.bf16 %v602_v41, %v599_v35 }
 0x10e   :  { %1335 = vst [vmem:[%s1754_s2 + $0x58] sm:$0xff] %v1223_v38   ;;  %1351 = vst [vmem:[%s1754_s2 + $0xd8] sm:$0xff] %v1303_v39  }
 0x10f   :  { %1334 = vst [vmem:[%s1754_s2 + $0x50] sm:$0xff] %v1218_v42   ;;  %1350 = vst [vmem:[%s1754_s2 + $0xd0] sm:$0xff] %v1298_v43  }
 0x111   :  { %v1423_v44 = vpop.f32.mrb[24].mxu0  ;;  %v1455_v45 = vpop.f32.mrb[24].mxu1 }
 0x112   :  { %v487_v46 = vpop.f32.mrb[25].mxu0  ;;  %v615_v47 = vpop.f32.mrb[25].mxu1 }
 0x113   :  { %v1424_v48 = vpop.f32.mrb[26].mxu0  ;;  %v1456_v49 = vpop.f32.mrb[26].mxu1 }
 0x114   :  { %v1233_v50 = vpack.c.bf16 %v1424_v48, %v1423_v44  ;;  %v1313_v51 = vpack.c.bf16 %v1456_v49, %v1455_v45  ;;  %v490_v52 = vpop.f32.mrb[27].mxu0  ;;  %v618_v53 = vpop.f32.mrb[27].mxu1 }
 0x115   :  { %v1228_v54 = vpack.c.bf16 %v490_v52, %v487_v46  ;;  %v1308_v55 = vpack.c.bf16 %v618_v53, %v615_v47 }
 0x116   :  { %1337 = vst [vmem:[%s1754_s2 + $0x68] sm:$0xff] %v1233_v50   ;;  %1353 = vst [vmem:[%s1754_s2 + $0xe8] sm:$0xff] %v1313_v51  }
 0x117   :  { %1336 = vst [vmem:[%s1754_s2 + $0x60] sm:$0xff] %v1228_v54   ;;  %1352 = vst [vmem:[%s1754_s2 + $0xe0] sm:$0xff] %v1308_v55  }
 0x119   :  { %v1427_v56 = vpop.f32.mrb[28].mxu0  ;;  %v1459_v57 = vpop.f32.mrb[28].mxu1 }
 0x11a   :  { %v503_v58 = vpop.f32.mrb[29].mxu0  ;;  %v631_v59 = vpop.f32.mrb[29].mxu1 }
 0x11b   :  { %v1428_v60 = vpop.f32.mrb[30].mxu0  ;;  %v1460_v61 = vpop.f32.mrb[30].mxu1 }
 0x11c   :  { %v1243_v62 = vpack.c.bf16 %v1428_v60, %v1427_v56  ;;  %v1323_v63 = vpack.c.bf16 %v1460_v61, %v1459_v57  ;;  %v506_v0 = vpop.f32.mrb[31].mxu0  ;;  %v634_v1 = vpop.f32.mrb[31].mxu1 }
 0x11d   :  { %v1238_v2 = vpack.c.bf16 %v506_v0, %v503_v58  ;;  %v1318_v3 = vpack.c.bf16 %v634_v1, %v631_v59 }
 0x11e   :  { %1339 = vst [vmem:[%s1754_s2 + $0x78] sm:$0xff] %v1243_v62   ;;  %1355 = vst [vmem:[%s1754_s2 + $0xf8] sm:$0xff] %v1323_v63  }
 0x11f   :  { %1338 = vst [vmem:[%s1754_s2 + $0x70] sm:$0xff] %v1238_v2   ;;  %1354 = vst [vmem:[%s1754_s2 + $0xf0] sm:$0xff] %v1318_v3  }

// kernel: conv_layer_forward.5
= control target key start
LH: loop header
LB: loop body
LE: loop exit
PB: predicated region body
PF: predicated region fallthrough
CT: control target
= control target key end

     0   :  { %10 = vsyncpa [#allocation3], 0  ;;  %s1272_s0 = inlined_call_operand.vmem [shape: bf16[2,256,128], index: 0, kind: input, shape index: {}]   ;;  %s1273_s1 = inlined_call_operand.vmem [shape: f32[2,1,128], index: 1, kind: input, shape index: {}]   ;;  %s1274_s2 = inlined_call_operand.vmem [shape: f32[2,1,128], index: 2, kind: input, shape index: {}]   ;;  %s1275_s3 = inlined_call_operand.vmem [shape: f32[1,1,128], index: 3, kind: input, shape index: {}]   ;;  %s1276_s4 = inlined_call_operand.vmem [shape: f32[1,1,128], index: 4, kind: input, shape index: {}]   ;;  %s1277_s5 = inlined_call_operand.hbm [shape: f32[2,256,128], index: 5, kind: output, shape index: {}]  }
   0x1   :  { %12 = vsyncpa [#allocation3 + $0x1], 0  ;;  %s986_s18 = smov 0   ;;  %s988_s19 = smov 0  }
   0x2   :  { %s990_s20 = smov 0   ;;  %s992_s21 = smov 0  }
   0x3   :  { %s994_s22 = smov 0   ;;  %s996_s23 = smov 0  }
   0x4 LB: > { %s718_s24 = sadd.s32 4294967295, %s951_s23   ;;  %s719_s25 = sadd.s32 4294967294, %s951_s23   ;;  %s951_s23 = sphi %s996_s23, %s18_s23   ;;  %s947_s22 = sphi %s994_s22, %s1284_s22   ;;  %s943_s21 = sphi %s992_s21, %s1283_s21   ;;  %s939_s20 = sphi %s990_s20, %s1282_s20   ;;  %s935_s19 = sphi %s988_s19, %s1281_s19   ;;  %s931_s18 = sphi %s986_s18, %s1280_s18  }
   0x5   : > { %s37_s26 = sadd.s32 1, %s947_s22  ;;  %s186_s27 = sadd.s32 1, %s939_s20 }
   0x6   : > { %p39_p0 = scmp.ge.s32.totalorder %s37_s26, 2  ;;  %p196_p1 = scmp.ne.s32.totalorder %s939_s20, %s935_s19 }
   0x7   : > { %p197_p2 = scmp.eq.s32.totalorder %s718_s24, 1  ;;  %p202_p3 = scmp.ne.s32.totalorder %s935_s19, %s931_s18 }
   0x8   : > { %s1286_s26 = smov (%p39_p0, %s37_s26), 0  ;;  %p203_p5 = scmp.eq.s32.totalorder %s719_s25, 1 }
   0x9   : > { %p1026_p4 = por %p197_p2, %p196_p1  ;;  %s179_s29 = ssub.s32 %s947_s22, %s1286_s26 }
   0xa   : > { %p724_p6 = scmp.ge.s32.totalorder %s951_s23, 1  ;;  %p184_p7 = scmp.eq.s32.totalorder %s179_s29, 0 }
   0xb   : > { %p1033_p8 = por %p203_p5, %p202_p3  ;;  %p267_p9 = scmp.lt.s32.totalorder %s951_s23, 3 }
   0xc   : > { %s1039_s6 = scalar_select %p184_p7, %s939_s20, %s186_s27  }
   0xd   : > { %p268_p10 = pnand %p724_p6, %p267_p9 }
   0xe   : > { %p321_p11 = scmp.lt.s32.totalorder (!%p268_p10), %s943_s21, 1  ;;  %v459_v0 = vlaneseq (!%p268_p10)  ;;  %v456_v2 = vld [vmem:[%s1275_s3] sm:$0x1] (!%p268_p10)  ;;  %s317_s27 = sand.u32 (!%p268_p10), 1, %s935_s19  }
   0xf   : > { %271 = sbr.rel (%p268_p10) target bundleno = 77 (0x4d), region = 40  ;;  %s725_s29 = sshll.u32 (!%p268_p10), %s317_s27, 8  ;;  %v1074_v22 = vld [vmem:[%s1276_s4] ss:$0 sm:$0xff] (!%p268_p10) }
  0x10   : > { %v460_v1 = vshrl.u32 (!%p268_p10), %v459_v0, 7  ;;  %s1099_s9 = scalar_lea.vmem (!%p268_p10), [#allocation2], %s725_s29  ;;  %s736_s10 = sshll.u32 (!%p268_p10), %s943_s21, 12 }
  0x11   : > { %s1218_s13 = scalar_lea.hbm (!%p268_p10), %s1277_s5, %s736_s10  ;;  %s1226_s14 = scalar_lea.sflag (!%p268_p10), [#allocation3], %s317_s27 }
  0x12   : > { %v461_v4 = vsub.s32 (!%p268_p10), 0, %v460_v1 }
  0x16   : > { %s322_s7 = scalar_select %p321_p11, %s943_s21, 1 }
  0x18   : > { %s735_s8 = sshll.u32 %s322_s7, 7  ;;  %s338_s11 = scalar_lea.vmem %s1273_s1, %s322_s7 }
  0x19   : > { %s1052_s16 = scalar_lea.vmem %s1272_s0, %s735_s8  ;;  %s344_s25 = scalar_lea.vmem %s1274_s2, %s322_s7  ;;  %v1057_v3 = vld [vmem:[%s338_s11] ss:$0 sm:$0xff] }
  0x1a   : > { %v738_v5 = vld [vmem:[%s1052_s16] sm:$0xff]   ;;  %v801_v7 = vld [vmem:[%s1052_s16 + $0x8] sm:$0xff]   ;;  %v802_v12 = vld [vmem:[%s1052_s16 + $0x10] sm:$0xff]   ;;  %s584_s11 = sshll.u32 %s1099_s9, 4  ;;  %s1220_s11 = int_to_ptr.vmem [resolvable:$true] %s584_s11 }
  0x1b   : > { %v455_v6 = vld [vmem:[%s344_s25] sm:$0x1]  ;;  %v739_v8 = vunpack.c.l.bf16 %v738_v5  ;;  %v740_v10 = vunpack.c.h.bf16 %v738_v5  ;;  %v743_v11 = vunpack.c.l.bf16 %v801_v7  ;;  %v803_v13 = vld [vmem:[%s1052_s16 + $0x18] sm:$0xff]   ;;  %v744_v14 = vunpack.c.h.bf16 %v801_v7  ;;  %v805_v36 = vld [vmem:[%s1052_s16 + $0x28] sm:$0xff]   ;;  %s873_s15 = scalar_lea.vmem %s1220_s11, 4096 }
  0x1c   : > { %v457_v9 = vmul.f32 %v456_v2, %v455_v6  ;;  %v747_v15 = vunpack.c.l.bf16 %v802_v12  ;;  %v748_v16 = vunpack.c.h.bf16 %v802_v12  ;;  %v751_v17 = vunpack.c.l.bf16 %v803_v13  ;;  %v804_v35 = vld [vmem:[%s1052_s16 + $0x20] sm:$0xff]   ;;  %v806_v41 = vld [vmem:[%s1052_s16 + $0x30] sm:$0xff]   ;;  %v807_v42 = vld [vmem:[%s1052_s16 + $0x38] sm:$0xff]   ;;  %p874_p12 = scmp.ne.s32.totalorder %s1220_s11, %s873_s15 }
  0x1d   : > { %v423_v18 = vsub.f32 %v739_v8, %v1057_v3  ;;  %v424_v20 = vsub.f32 %v740_v10, %v1057_v3  ;;  %v425_v21 = vsub.f32 %v743_v11, %v1057_v3  ;;  %v426_v23 = vsub.f32 %v744_v14, %v1057_v3  ;;  %v808_v8 = vld [vmem:[%s1052_s16 + $0x40] sm:$0xff]   ;;  %v810_v14 = vld [vmem:[%s1052_s16 + $0x50] sm:$0xff]  }
  0x1e   : > { %v1067_v19 = vrot.slane %v457_v9, %v461_v4  ;;  %v427_v24 = vsub.f32 %v747_v15, %v1057_v3  ;;  %v428_v25 = vsub.f32 %v748_v16, %v1057_v3  ;;  %v429_v26 = vsub.f32 %v751_v17, %v1057_v3  ;;  %v809_v9 = vld [vmem:[%s1052_s16 + $0x48] sm:$0xff]   ;;  %v811_v15 = vld [vmem:[%s1052_s16 + $0x58] sm:$0xff]   ;;  %p875_p13 = pnand %p874_p12, %p1026_p4 }
  0x1f   : > { %v752_v30 = vunpack.c.h.bf16 %v803_v13  ;;  %v755_v48 = vunpack.c.l.bf16 %v804_v35  ;;  %v756_v49 = vunpack.c.h.bf16 %v804_v35  ;;  %v759_v50 = vunpack.c.l.bf16 %v805_v36 }
  0x20   : > { %v464_v27 = vmul.f32 %v1067_v19, %v423_v18  ;;  %v465_v28 = vmul.f32 %v1067_v19, %v424_v20  ;;  %v466_v29 = vmul.f32 %v1067_v19, %v425_v21  ;;  %v467_v31 = vmul.f32 %v1067_v19, %v426_v23  ;;  %p876_p0 = pneg %p875_p13 }
  0x21   : > { %v468_v32 = vmul.f32 %v1067_v19, %v427_v24  ;;  %v469_v33 = vmul.f32 %v1067_v19, %v428_v25  ;;  %v470_v34 = vmul.f32 %v1067_v19, %v429_v26  ;;  %v430_v40 = vsub.f32 %v752_v30, %v1057_v3 }
  0x22   : > { %v503_v37 = vadd.f32 %v1074_v22, %v464_v27  ;;  %v504_v38 = vadd.f32 %v1074_v22, %v465_v28  ;;  %v505_v39 = vadd.f32 %v1074_v22, %v466_v29  ;;  %v506_v43 = vadd.f32 %v1074_v22, %v467_v31 }
  0x23   : > { %v507_v44 = vadd.f32 %v1074_v22, %v468_v32  ;;  %v508_v45 = vadd.f32 %v1074_v22, %v469_v33  ;;  %v509_v46 = vadd.f32 %v1074_v22, %v470_v34  ;;  %v471_v47 = vmul.f32 %v1067_v19, %v430_v40 }
  0x24   : > { %535 = vst [vmem:[%s1099_s9] sm:$0xff] %v503_v37  ;;  %536 = vst [vmem:[%s1099_s9 + $0x8] sm:$0xff] %v504_v38  ;;  %v760_v51 = vunpack.c.h.bf16 %v805_v36  ;;  %v763_v52 = vunpack.c.l.bf16 %v806_v41  ;;  %v764_v53 = vunpack.c.h.bf16 %v806_v41  ;;  %v767_v54 = vunpack.c.l.bf16 %v807_v42 }
  0x25   : > { %537 = vst [vmem:[%s1099_s9 + $0x10] sm:$0xff] %v505_v39  ;;  %538 = vst [vmem:[%s1099_s9 + $0x18] sm:$0xff] %v506_v43  ;;  %v510_v55 = vadd.f32 %v1074_v22, %v471_v47  ;;  %v431_v56 = vsub.f32 %v755_v48, %v1057_v3  ;;  %v432_v57 = vsub.f32 %v756_v49, %v1057_v3  ;;  %v768_v2 = vunpack.c.h.bf16 %v807_v42  ;;  %v813_v47 = vld [vmem:[%s1052_s16 + $0x68] sm:$0xff]  }
  0x26   : > { %539 = vst [vmem:[%s1099_s9 + $0x20] sm:$0xff] %v507_v44  ;;  %540 = vst [vmem:[%s1099_s9 + $0x28] sm:$0xff] %v508_v45  ;;  %v433_v58 = vsub.f32 %v759_v50, %v1057_v3  ;;  %v434_v59 = vsub.f32 %v760_v51, %v1057_v3  ;;  %v435_v60 = vsub.f32 %v763_v52, %v1057_v3  ;;  %v771_v23 = vunpack.c.l.bf16 %v808_v8  ;;  %v814_v52 = vld [vmem:[%s1052_s16 + $0x70] sm:$0xff]  }
  0x27   : > { %541 = vst [vmem:[%s1099_s9 + $0x30] sm:$0xff] %v509_v46  ;;  %v436_v61 = vsub.f32 %v764_v53, %v1057_v3  ;;  %v437_v62 = vsub.f32 %v767_v54, %v1057_v3  ;;  %542 = vst [vmem:[%s1099_s9 + $0x38] sm:$0xff] %v510_v55  ;;  %v472_v63 = vmul.f32 %v1067_v19, %v431_v56  ;;  %v772_v24 = vunpack.c.h.bf16 %v808_v8  ;;  %v812_v46 = vld [vmem:[%s1052_s16 + $0x60] sm:$0xff]   ;;  %v815_v53 = vld [vmem:[%s1052_s16 + $0x78] sm:$0xff]   ;;  %s953_s16 = smov [#allocation2]  }
  0x28   : > { %v473_v0 = vmul.f32 %v1067_v19, %v432_v57  ;;  %v474_v1 = vmul.f32 %v1067_v19, %v433_v58  ;;  %v475_v4 = vmul.f32 %v1067_v19, %v434_v59  ;;  %v476_v5 = vmul.f32 %v1067_v19, %v435_v60  ;;  %s877_s17 = sshll.u32 %s953_s16, 4  ;;  %s878_s17 = int_to_ptr.vmem [resolvable:$false] %s877_s17 }
  0x29   : > { %v477_v6 = vmul.f32 %v1067_v19, %v436_v61  ;;  %v478_v7 = vmul.f32 %v1067_v19, %v437_v62  ;;  %v511_v10 = vadd.f32 %v1074_v22, %v472_v63  ;;  %v438_v13 = vsub.f32 %v768_v2, %v1057_v3  ;;  %s879_s24 = scalar_lea.vmem %s878_s17, 8192  ;;  %p880_p1 = scmp.lt.s32.totalorder %s1220_s11, %s878_s17 }
  0x2a   : > { %v512_v11 = vadd.f32 %v1074_v22, %v473_v0  ;;  %v513_v12 = vadd.f32 %v1074_v22, %v474_v1  ;;  %v514_v16 = vadd.f32 %v1074_v22, %v475_v4  ;;  %v515_v17 = vadd.f32 %v1074_v22, %v476_v5  ;;  %p881_p2 = scmp.lt.s32.totalorder %s879_s24, %s873_s15 }
  0x2b   : > { %v516_v18 = vadd.f32 %v1074_v22, %v477_v6  ;;  %v517_v20 = vadd.f32 %v1074_v22, %v478_v7  ;;  %543 = vst [vmem:[%s1099_s9 + $0x40] sm:$0xff] %v511_v10  ;;  %v479_v21 = vmul.f32 %v1067_v19, %v438_v13  ;;  %v775_v25 = vunpack.c.l.bf16 %v809_v9 }
  0x2c   : > { %544 = vst [vmem:[%s1099_s9 + $0x48] sm:$0xff] %v512_v11  ;;  %545 = vst [vmem:[%s1099_s9 + $0x50] sm:$0xff] %v513_v12  ;;  %v776_v26 = vunpack.c.h.bf16 %v809_v9  ;;  %v779_v27 = vunpack.c.l.bf16 %v810_v14  ;;  %v780_v28 = vunpack.c.h.bf16 %v810_v14  ;;  %v783_v29 = vunpack.c.l.bf16 %v811_v15  ;;  %p882_p3 = por %p881_p2, %p880_p1 }
  0x2d   : > { %546 = vst [vmem:[%s1099_s9 + $0x58] sm:$0xff] %v514_v16  ;;  %547 = vst [vmem:[%s1099_s9 + $0x60] sm:$0xff] %v515_v17  ;;  %v518_v30 = vadd.f32 %v1074_v22, %v479_v21  ;;  %v439_v31 = vsub.f32 %v771_v23, %v1057_v3  ;;  %v440_v32 = vsub.f32 %v772_v24, %v1057_v3  ;;  %v784_v41 = vunpack.c.h.bf16 %v811_v15 }
  0x2e   : > { %548 = vst [vmem:[%s1099_s9 + $0x68] sm:$0xff] %v516_v18  ;;  %549 = vst [vmem:[%s1099_s9 + $0x70] sm:$0xff] %v517_v20  ;;  %v441_v33 = vsub.f32 %v775_v25, %v1057_v3  ;;  %v442_v34 = vsub.f32 %v776_v26, %v1057_v3  ;;  %v443_v35 = vsub.f32 %v779_v27, %v1057_v3  ;;  %v787_v59 = vunpack.c.l.bf16 %v812_v46  ;;  %p883_p5 = pnand %p882_p3, %p876_p0 }
  0x2f   : > { %v444_v36 = vsub.f32 %v780_v28, %v1057_v3  ;;  %v445_v37 = vsub.f32 %v783_v29, %v1057_v3  ;;  %550 = vst [vmem:[%s1099_s9 + $0x78] sm:$0xff] %v518_v30  ;;  %v480_v38 = vmul.f32 %v1067_v19, %v439_v31  ;;  %v481_v39 = vmul.f32 %v1067_v19, %v440_v32 }
  0x30   : > { %v482_v40 = vmul.f32 %v1067_v19, %v441_v33  ;;  %v483_v42 = vmul.f32 %v1067_v19, %v442_v34  ;;  %v484_v43 = vmul.f32 %v1067_v19, %v443_v35  ;;  %v446_v51 = vsub.f32 %v784_v41, %v1057_v3 }
  0x31   : > { %v485_v44 = vmul.f32 %v1067_v19, %v444_v36  ;;  %v486_v45 = vmul.f32 %v1067_v19, %v445_v37  ;;  %v519_v48 = vadd.f32 %v1074_v22, %v480_v38  ;;  %v520_v49 = vadd.f32 %v1074_v22, %v481_v39 }
  0x32   : > { %v521_v50 = vadd.f32 %v1074_v22, %v482_v40  ;;  %v522_v54 = vadd.f32 %v1074_v22, %v483_v42  ;;  %v523_v55 = vadd.f32 %v1074_v22, %v484_v43  ;;  %v487_v58 = vmul.f32 %v1067_v19, %v446_v51 }
  0x33   : > { %v524_v56 = vadd.f32 %v1074_v22, %v485_v44  ;;  %v525_v57 = vadd.f32 %v1074_v22, %v486_v45  ;;  %551 = vst [vmem:[%s1099_s9 + $0x80] sm:$0xff] %v519_v48  ;;  %552 = vst [vmem:[%s1099_s9 + $0x88] sm:$0xff] %v520_v49  ;;  %v788_v60 = vunpack.c.h.bf16 %v812_v46  ;;  %v791_v61 = vunpack.c.l.bf16 %v813_v47 }
  0x34   : > { %553 = vst [vmem:[%s1099_s9 + $0x90] sm:$0xff] %v521_v50  ;;  %554 = vst [vmem:[%s1099_s9 + $0x98] sm:$0xff] %v522_v54  ;;  %v792_v62 = vunpack.c.h.bf16 %v813_v47  ;;  %v795_v63 = vunpack.c.l.bf16 %v814_v52  ;;  %v796_v0 = vunpack.c.h.bf16 %v814_v52  ;;  %v799_v1 = vunpack.c.l.bf16 %v815_v53 }
  0x35   : > { %555 = vst [vmem:[%s1099_s9 + $0xa0] sm:$0xff] %v523_v55  ;;  %556 = vst [vmem:[%s1099_s9 + $0xa8] sm:$0xff] %v524_v56  ;;  %v526_v2 = vadd.f32 %v1074_v22, %v487_v58  ;;  %v447_v4 = vsub.f32 %v787_v59, %v1057_v3  ;;  %v448_v5 = vsub.f32 %v788_v60, %v1057_v3  ;;  %v800_v14 = vunpack.c.h.bf16 %v815_v53 }
  0x36   : > { %557 = vst [vmem:[%s1099_s9 + $0xb0] sm:$0xff] %v525_v57  ;;  %v449_v6 = vsub.f32 %v791_v61, %v1057_v3  ;;  %v450_v7 = vsub.f32 %v792_v62, %v1057_v3  ;;  %v451_v8 = vsub.f32 %v795_v63, %v1057_v3  ;;  %v452_v9 = vsub.f32 %v796_v0, %v1057_v3 }
  0x37   : > { %v453_v10 = vsub.f32 %v799_v1, %v1057_v3  ;;  %558 = vst [vmem:[%s1099_s9 + $0xb8] sm:$0xff] %v526_v2  ;;  %v488_v11 = vmul.f32 %v1067_v19, %v447_v4  ;;  %v489_v12 = vmul.f32 %v1067_v19, %v448_v5  ;;  %v454_v24 = vsub.f32 %v800_v14, %v1057_v3 }
  0x38   : > { %v490_v13 = vmul.f32 %v1067_v19, %v449_v6  ;;  %v491_v15 = vmul.f32 %v1067_v19, %v450_v7  ;;  %v492_v16 = vmul.f32 %v1067_v19, %v451_v8  ;;  %v493_v17 = vmul.f32 %v1067_v19, %v452_v9 }
  0x39   : > { %v494_v18 = vmul.f32 %v1067_v19, %v453_v10  ;;  %v527_v20 = vadd.f32 %v1074_v22, %v488_v11  ;;  %v528_v21 = vadd.f32 %v1074_v22, %v489_v12  ;;  %v495_v29 = vmul.f32 %v1067_v19, %v454_v24 }
  0x3a   : > { %v529_v23 = vadd.f32 %v1074_v22, %v490_v13  ;;  %v530_v25 = vadd.f32 %v1074_v22, %v491_v15  ;;  %v531_v26 = vadd.f32 %v1074_v22, %v492_v16  ;;  %v532_v27 = vadd.f32 %v1074_v22, %v493_v17 }
  0x3b   : > { %v533_v28 = vadd.f32 %v1074_v22, %v494_v18  ;;  %559 = vst [vmem:[%s1099_s9 + $0xc0] sm:$0xff] %v527_v20  ;;  %560 = vst [vmem:[%s1099_s9 + $0xc8] sm:$0xff] %v528_v21  ;;  %v534_v3 = vadd.f32 %v1074_v22, %v495_v29 }
  0x3c   : > { %561 = vst [vmem:[%s1099_s9 + $0xd0] sm:$0xff] %v529_v23  ;;  %562 = vst [vmem:[%s1099_s9 + $0xd8] sm:$0xff] %v530_v25 }
  0x3d   : > { %563 = vst [vmem:[%s1099_s9 + $0xe0] sm:$0xff] %v531_v26  ;;  %564 = vst [vmem:[%s1099_s9 + $0xe8] sm:$0xff] %v532_v27 }
  0x3e   : > { %565 = vst [vmem:[%s1099_s9 + $0xf0] sm:$0xff] %v533_v28  ;;  %566 = vst [vmem:[%s1099_s9 + $0xf8] sm:$0xff] %v534_v3 }
  0x3f   : > { %886 = shalt.err (!%p883_p5)
}
  0x40   : > { %s887_s25 = scalar_lea.hbm %s1218_s13, 4096  ;;  %s891_s7 = scalar_lea.hbm %s1277_s5, 8192 }
  0x41   : > { %p888_p6 = scmp.ne.s32.totalorder %s1218_s13, %s887_s25  ;;  %p892_p10 = scmp.lt.u32.totalorder %s1218_s13, %s1277_s5 }
  0x42   : > { %p893_p11 = scmp.lt.u32.totalorder %s891_s7, %s887_s25  ;;  %p895_p13 = scmp.lt.u32.totalorder %s887_s25, %s1218_s13 }
  0x43   : > { %p889_p7 = pnand %p888_p6, %p1026_p4 }
  0x44   : > { %p894_p12 = por %p893_p11, %p892_p10 }
  0x45   : > { %p890_p9 = pneg %p889_p7 }
  0x46   : > { %p896_p0 = por %p895_p13, %p894_p12 }
  0x48   : > { %p897_p1 = pnand %p896_p0, %p890_p9 }
  0x4a   : > { %900 = shalt.err (!%p897_p1)
}
  0x4b   : > { %s954_s10 = smov 128   ;;  %s955_s21 = smov 8  }
  0x4c   : > { %816 = dma.vmem_to_hbm [thread:$0]  (%p1026_p4), %s1220_s11, 4096, %s1218_s13, %s1226_s14, %s954_s10, %s954_s10, %s955_s21  }
  0x4d PF: > { %p822_p2 = scmp.ge.s32.totalorder %s951_s23, 2  ;;  %s599_s12 = sand.u32 1, %s931_s18  }
  0x4e   : > { %s600_s15 = scalar_lea.sflag [#allocation3], %s599_s12 }
  0x4f   : > { %p819_p3 = pnand %p822_p2, %p1033_p8 }
  0x51   : > { %926 = dma.done.wait (!%p819_p3), %s600_s15, 4096  }
  0x52   : > { %928 = vsyncadd (!%p819_p3), %s600_s15, 4294963200  ;;  %s18_s23 = sadd.s32 1, %s951_s23   ;;  %s1280_s18 = smov %s935_s19 }
  0x53   : > { %p15_p5 = scmp.ge.s32.totalorder %s18_s23, 4   ;;  %s1281_s19 = smov %s939_s20 }
  0x54   : > { %s1282_s20 = smov %s1039_s6  ;;  %s1283_s21 = smov %s947_s22 }
  0x55   : > { %s1284_s22 = smov %s1286_s26  ;;  %17 = sbr.rel (!%p15_p5) target bundleno = 4 (0x4), region = 87 }
  0x5c   :  { %605 = vsyncpa [#allocation3], 1 }
  0x5d   :  { %607 = vsyncpa [#allocation3 + $0x1], 1 }

</bundles_post_ra>
